<compile_context>
chip_gen: v7x
topology: tpu7x:2x2x1
jax: 0.10.0
libtpu: 0.0.40
codegen_flags: <defaults>
</compile_context>

<pallas_src>
import functools

import jax
import jax.numpy as jnp
from jax import lax
from jax.experimental import pallas as pl
from jax.experimental.pallas import tpu as pltpu

_LANE = 128
_SUBLANE = 8
_LOG2 = 0.6931471805599453


def _log_cosh_kernel(yt_ref, yp_ref, out_ref, acc_ref, *,
                     block_rows, blocks_per_split, valid_rows, full_blocks,
                     need_mask):
    c = pl.program_id(0)          # TensorCore split (parallel)
    i = pl.program_id(1)          # block within split (reduction axis)

    @pl.when(i == 0)
    def _():
        acc_ref[...] = jnp.zeros_like(acc_ref)

    yt = yt_ref[...].astype(jnp.float32)
    yp = yp_ref[...].astype(jnp.float32)
    d = (yt - yp) + jnp.float32(1e-12)      # same +1e-12 as the PyTorch module
    ad = jnp.abs(d)
    # log(cosh(d)) + log(2) = |d| + log(1 + exp(-2|d|)).  The constant log(2)
    # is subtracted exactly once per element in the final mean, outside the
    # kernel (masked / padded elements contribute 0 either way).
    vals = ad + jnp.log(1.0 + jnp.exp(-2.0 * ad))

    def _accumulate(v):
        # Per-lane partial sums into one (8,128) vreg accumulator (VPU adds).
        acc_ref[...] += v.reshape(block_rows // _SUBLANE, _SUBLANE, _LANE).sum(axis=0)

    if need_mask:
        logical_block = c * blocks_per_split + i
        is_edge = logical_block >= full_blocks   # partial last block / clamped dup

        @pl.when(is_edge)
        def _():
            row0 = logical_block * block_rows    # UNclamped offset: dup blocks mask to 0
            row_ids = lax.broadcasted_iota(jnp.int32, (block_rows, _LANE), 0) + row0
            _accumulate(jnp.where(row_ids < valid_rows, vals, 0.0))

        @pl.when(jnp.logical_not(is_edge))
        def _():
            _accumulate(vals)
    else:
        _accumulate(vals)

    @pl.when(i == pl.num_programs(1) - 1)
    def _():
        out_ref[...] = acc_ref[...].reshape(1, _SUBLANE, _LANE)


def log_cosh_loss(y_true, y_predicted, *, block_rows=None):
    assert y_true.shape == y_predicted.shape
    n = y_true.size
    assert n > 0

    yt = y_true.reshape(-1)
    yp = y_predicted.reshape(-1)

    total = jnp.zeros((), jnp.float32)

    # Lane-aligned prefix handled by the kernel; <128-element tail in JAX.
    n_body = (n // _LANE) * _LANE
    rows = n_body // _LANE

    if rows >= _SUBLANE:
        yt2 = (yt if n_body == n else yt[:n_body]).reshape(rows, _LANE)
        yp2 = (yp if n_body == n else yp[:n_body]).reshape(rows, _LANE)

        if block_rows is None:
            itemsize = jnp.dtype(yt2.dtype).itemsize
            # ~2 MiB per input per pipeline buffer regardless of dtype.
            block_rows = 8192 if itemsize <= 2 else 4096
        block_rows = max(_SUBLANE, (min(block_rows, rows) // _SUBLANE) * _SUBLANE)

        blocks_total = pl.cdiv(rows, block_rows)
        num_splits = min(2, blocks_total)
        blocks_per_split = pl.cdiv(blocks_total, num_splits)
        last_block = blocks_total - 1
        full_blocks = rows // block_rows             # blocks with no invalid rows
        need_mask = (rows % block_rows != 0) or (num_splits * blocks_per_split
                                                 != blocks_total)

        # Clamp so any redundant block (odd blocks_total) re-reads valid data;
        # the in-kernel mask (using the unclamped index) zeroes its contribution.
        def in_map(c, i):
            return (jnp.minimum(c * blocks_per_split + i, last_block), 0)

        kernel = functools.partial(
            _log_cosh_kernel,
            block_rows=block_rows,
            blocks_per_split=blocks_per_split,
            valid_rows=rows,
            full_blocks=full_blocks,
            need_mask=need_mask,
        )

        partials = pl.pallas_call(
            kernel,
            out_shape=jax.ShapeDtypeStruct((num_splits, _SUBLANE, _LANE),
                                           jnp.float32),
            grid_spec=pltpu.PrefetchScalarGridSpec(
                num_scalar_prefetch=0,
                grid=(num_splits, blocks_per_split),
                in_specs=[
                    pl.BlockSpec((block_rows, _LANE), in_map),
                    pl.BlockSpec((block_rows, _LANE), in_map),
                ],
                out_specs=pl.BlockSpec((1, _SUBLANE, _LANE),
                                       lambda c, i: (c, 0, 0)),
                scratch_shapes=[pltpu.VMEM((_SUBLANE, _LANE), jnp.float32)],
            ),
            compiler_params=pltpu.CompilerParams(
                dimension_semantics=("parallel", "arbitrary"),
                vmem_limit_bytes=32 * 1024 * 1024,
            ),
        )(yt2, yp2)

        total = total + jnp.sum(partials)
    else:
        # Too small for a single (8,128) tile: do everything in plain JAX.
        n_body = 0

    if n_body < n:
        dt = (yt[n_body:].astype(jnp.float32)
              - yp[n_body:].astype(jnp.float32)) + jnp.float32(1e-12)
        ad = jnp.abs(dt)
        total = total + jnp.sum(ad + jnp.log(1.0 + jnp.exp(-2.0 * ad)))

    # mean(log cosh) = (sum over n of (|d| + log(1+exp(-2|d|)))) / n - log(2)
    return total / jnp.float32(n) - jnp.float32(_LOG2)


if __name__ == "__main__":
    key = jax.random.PRNGKey(0)
    k1, k2 = jax.random.split(key)
    shape = (2, 4, 16, 16)  # NCHW-like small test shape -> 2048 elements
    y_true = jax.random.normal(k1, shape, dtype=jnp.float32)
    y_pred = jax.random.normal(k2, shape, dtype=jnp.float32)

    loss = log_cosh_loss(y_true, y_pred)
    loss = jax.block_until_ready(loss)

    # Reference check in plain JAX (same formula as the PyTorch module).
    ref = jnp.mean(jnp.log(jnp.cosh((y_true - y_pred) + 1e-12)))
    assert jnp.allclose(loss, ref, rtol=1e-5, atol=1e-6), (loss, ref)

    print("KERNEL_OK")
</pallas_src>

<mosaic_0001>
module attributes {stable_mosaic.version = 11 : i64} {
  func.func @_log_cosh_kernel(%arg0: i32, %arg1: i32, %arg2: memref<16x128xf32, #tpu.memory_space<vmem>>, %arg3: memref<16x128xf32, #tpu.memory_space<vmem>>, %arg4: memref<1x8x128xf32, #tpu.memory_space<vmem>>, %arg5: memref<8x128xf32, #tpu.memory_space<vmem>>) attributes {dimension_semantics = [#tpu.dimension_semantics<parallel>, #tpu.dimension_semantics<arbitrary>], iteration_bounds = array<i64: 1, 1>, scalar_prefetch = 0 : i64, scratch_operands = 1 : i64, tpu.core_type = #tpu.core_type<tc>, window_params = [{transform_indices = @transform_0, window_bounds = array<i64: 16, 128>}, {transform_indices = @transform_1, window_bounds = array<i64: 16, 128>}, {transform_indices = @transform_2, window_bounds = array<i64: 1, 8, 128>}]} {
    %c0_i32 = arith.constant 0 : i32
    %0 = arith.cmpi eq, %arg1, %c0_i32 : i32
    %1 = arith.extui %0 : i1 to i32
    %c0_i32_0 = arith.constant 0 : i32
    %2 = arith.cmpi ne, %1, %c0_i32_0 : i32
    scf.if %2 {
      %cst_13 = arith.constant 0.000000e+00 : f32
      %24 = vector.broadcast %cst_13 : f32 to vector<8x128xf32>
      %c0_14 = arith.constant 0 : index
      %c0_15 = arith.constant 0 : index
      %25 = vector.load %arg5[%c0_14, %c0_15] : memref<8x128xf32, #tpu.memory_space<vmem>>, vector<8x128xf32>
      tpu.vector_store %arg5[%c0_14, %c0_15], %24 {strides = array<i32>} : memref<8x128xf32, #tpu.memory_space<vmem>>, vector<8x128xf32>,
    } else {
    }
    %c0 = arith.constant 0 : index
    %c0_1 = arith.constant 0 : index
    %3 = vector.load %arg2[%c0, %c0_1] : memref<16x128xf32, #tpu.memory_space<vmem>>, vector<16x128xf32>
    %c0_2 = arith.constant 0 : index
    %c0_3 = arith.constant 0 : index
    %4 = vector.load %arg3[%c0_2, %c0_3] : memref<16x128xf32, #tpu.memory_space<vmem>>, vector<16x128xf32>
    %5 = arith.subf %3, %4 : vector<16x128xf32>
    %cst = arith.constant 9.99999996E-13 : f32
    %6 = vector.broadcast %cst : f32 to vector<16x128xf32>
    %7 = arith.addf %5, %6 : vector<16x128xf32>
    %8 = math.absf %7 : vector<16x128xf32>
    %cst_4 = arith.constant -2.000000e+00 : f32
    %9 = vector.broadcast %cst_4 : f32 to vector<16x128xf32>
    %10 = arith.mulf %9, %8 : vector<16x128xf32>
    %11 = math.exp %10 : vector<16x128xf32>
    %cst_5 = arith.constant 1.000000e+00 : f32
    %12 = vector.broadcast %cst_5 : f32 to vector<16x128xf32>
    %13 = arith.addf %12, %11 : vector<16x128xf32>
    %14 = math.log %13 : vector<16x128xf32>
    %15 = arith.addf %8, %14 : vector<16x128xf32>
    %c0_6 = arith.constant 0 : index
    %c0_7 = arith.constant 0 : index
    %16 = vector.load %arg5[%c0_6, %c0_7] : memref<8x128xf32, #tpu.memory_space<vmem>>, vector<8x128xf32>
    %17 = vector.shape_cast %15 : vector<16x128xf32> to vector<2x8x128xf32>
    %cst_8 = arith.constant dense<0.000000e+00> : vector<8x128xf32>
    %18 = vector.multi_reduction <add>, %17, %cst_8 [0] : vector<2x8x128xf32> to vector<8x128xf32>
    %19 = arith.addf %16, %18 : vector<8x128xf32>
    %c0_9 = arith.constant 0 : index
    %c0_10 = arith.constant 0 : index
    %20 = vector.load %arg5[%c0_9, %c0_10] : memref<8x128xf32, #tpu.memory_space<vmem>>, vector<8x128xf32>
    tpu.vector_store %arg5[%c0_9, %c0_10], %19 {strides = array<i32>} : memref<8x128xf32, #tpu.memory_space<vmem>>, vector<8x128xf32>,
    %c0_i32_11 = arith.constant 0 : i32
    %21 = arith.cmpi eq, %arg1, %c0_i32_11 : i32
    %22 = arith.extui %21 : i1 to i32
    %c0_i32_12 = arith.constant 0 : i32
    %23 = arith.cmpi ne, %22, %c0_i32_12 : i32
    scf.if %23 {
      %c0_13 = arith.constant 0 : index
      %c0_14 = arith.constant 0 : index
      %24 = vector.load %arg5[%c0_13, %c0_14] : memref<8x128xf32, #tpu.memory_space<vmem>>, vector<8x128xf32>
      %25 = vector.shape_cast %24 : vector<8x128xf32> to vector<1x8x128xf32>
      %c0_15 = arith.constant 0 : index
      %c0_16 = arith.constant 0 : index
      %c0_17 = arith.constant 0 : index
      %26 = vector.load %arg4[%c0_15, %c0_16, %c0_17] : memref<1x8x128xf32, #tpu.memory_space<vmem>>, vector<1x8x128xf32>
      tpu.vector_store %arg4[%c0_15, %c0_16, %c0_17], %25 {strides = array<i32>} : memref<1x8x128xf32, #tpu.memory_space<vmem>>, vector<1x8x128xf32>,
    } else {
    }
    return
  }
  func.func @transform_0(%arg0: i32, %arg1: i32) -> (i32, i32) {
    %c1_i32 = arith.constant 1 : i32
    %0 = arith.muli %arg0, %c1_i32 : i32
    %1 = arith.addi %0, %arg1 : i32
    %c0_i32 = arith.constant 0 : i32
    %2 = arith.minsi %1, %c0_i32 : i32
    %c0_i32_0 = arith.constant 0 : i32
    %c0_i32_1 = arith.constant 0 : i32
    return %2, %c0_i32_0 : i32, i32
  }
  func.func @transform_1(%arg0: i32, %arg1: i32) -> (i32, i32) {
    %c1_i32 = arith.constant 1 : i32
    %0 = arith.muli %arg0, %c1_i32 : i32
    %1 = arith.addi %0, %arg1 : i32
    %c0_i32 = arith.constant 0 : i32
    %2 = arith.minsi %1, %c0_i32 : i32
    %c0_i32_0 = arith.constant 0 : i32
    %c0_i32_1 = arith.constant 0 : i32
    return %2, %c0_i32_0 : i32, i32
  }
  func.func @transform_2(%arg0: i32, %arg1: i32) -> (i32, i32, i32) {
    %c0_i32 = arith.constant 0 : i32
    %c0_i32_0 = arith.constant 0 : i32
    %c0_i32_1 = arith.constant 0 : i32
    return %arg0, %c0_i32, %c0_i32_0 : i32, i32, i32
  }
}

</mosaic_0001>

<bundles_post_ra>
// kernel: tpu_custom_call.1
= control target key start
LH: loop header
LB: loop body
LE: loop exit
PB: predicated region body
PF: predicated region fallthrough
CT: control target
= control target key end

     0   :  { %7 = vsyncpa [#allocation4], 0  ;;  %s259_s0 = inlined_call_operand.hbm [shape: f32[16,128], index: 0, kind: input, shape index: {}]   ;;  %s260_s1 = inlined_call_operand.hbm [shape: f32[16,128], index: 1, kind: input, shape index: {}]   ;;  %s261_s2 = inlined_call_operand.hbm [shape: f32[1,8,128], index: 2, kind: output, shape index: {}]  }
   0x1   :  { %8 = vsyncpa [#allocation7], 0 }
   0x2   :  { %9 = vsyncpa [#allocation5], 0  ;;  %s203_s9 = smov [#allocation3]   ;;  %s131_s13 = scalar_lea.hbm %s259_s0, 256 }
   0x3   :  { %s21_s10 = sshll.u32 %s203_s9, 4  ;;  %p132_p0 = scmp.ne.s32.totalorder %s259_s0, %s131_s13  ;;  %s22_s10 = int_to_ptr.vmem [resolvable:$true] %s21_s10 }
   0x4   :  { %p135_p1 = scmp.lt.u32.totalorder %s131_s13, %s259_s0 }
   0x6   :  { %p137_p2 = pnand %p135_p1, %p132_p0 }
   0x8   :  { %140 = shalt.err (!%p137_p2)
}
   0x9   :  { %s141_s18 = scalar_lea.vmem %s22_s10, 256  ;;  %p146_p4 = scmp.lt.s32.totalorder %s22_s10, %s22_s10 }
   0xa   :  { %p142_p3 = scmp.ne.s32.totalorder %s22_s10, %s141_s18  ;;  %p147_p5 = scmp.lt.s32.totalorder %s141_s18, %s141_s18 }
   0xc   :  { %p148_p6 = por %p147_p5, %p146_p4 }
   0xe   :  { %p149_p7 = pnand %p148_p6, %p142_p3 }
  0x10   :  { %152 = shalt.err (!%p149_p7)
}
  0x11   :  { %s204_s19 = smov 128   ;;  %s205_s20 = smov 8  }
  0x12   :  { %27 = dma.hbm_to_vmem [thread:$0]  %s259_s0, 256, %s22_s10, [#allocation4], %s204_s19, %s204_s19, %s205_s20  }
  0x13   :  { %s206_s23 = smov [#allocation6]   ;;  %s153_s27 = scalar_lea.hbm %s260_s1, 256 }
  0x14   :  { %s39_s24 = sshll.u32 %s206_s23, 4  ;;  %p154_p8 = scmp.ne.s32.totalorder %s260_s1, %s153_s27  ;;  %s40_s24 = int_to_ptr.vmem [resolvable:$true] %s39_s24 }
  0x15   :  { %p157_p9 = scmp.lt.u32.totalorder %s153_s27, %s260_s1 }
  0x17   :  { %p159_p10 = pnand %p157_p9, %p154_p8 }
  0x19   :  { %162 = shalt.err (!%p159_p10)
}
  0x1a   :  { %s163_s4 = scalar_lea.vmem %s40_s24, 256  ;;  %p168_p12 = scmp.lt.s32.totalorder %s40_s24, %s40_s24 }
  0x1b   :  { %p164_p11 = scmp.ne.s32.totalorder %s40_s24, %s163_s4  ;;  %p169_p13 = scmp.lt.s32.totalorder %s163_s4, %s163_s4 }
  0x1d   :  { %p170_p0 = por %p169_p13, %p168_p12 }
  0x1f   :  { %p171_p1 = pnand %p170_p0, %p164_p11 }
  0x21   :  { %174 = shalt.err (!%p171_p1)
}
  0x22   :  { %45 = dma.hbm_to_vmem [thread:$0]  %s260_s1, 256, %s40_s24, [#allocation7], %s204_s19, %s204_s19, %s205_s20  }
  0x23   :  { %197 = dma.done.wait [#allocation4], 256  }
  0x24   :  { %198 = vsyncadd [#allocation4], 4294967040 }
  0x25   :  { %199 = dma.done.wait [#allocation7], 256  }
  0x26   :  { %200 = vsyncadd [#allocation7], 4294967040  ;;  %v65_v0 = vld [vmem:[#allocation3] sm:$0xff]  ;;  %v66_v1 = vld [vmem:[#allocation3 + $0x8] sm:$0xff]  ;;  %s207_s1 = smov [#allocation8]  }
  0x27   :  { %v67_v2 = vld [vmem:[#allocation6] sm:$0xff]  ;;  %v68_v3 = vld [vmem:[#allocation6 + $0x8] sm:$0xff]  ;;  %s104_s6 = sshll.u32 %s207_s1, 4  ;;  %s105_s6 = int_to_ptr.vmem [resolvable:$true] %s104_s6 }
  0x28   :  { %v69_v4 = vsub.f32 %v65_v0, %v67_v2  ;;  %v70_v5 = vsub.f32 %v66_v1, %v68_v3  ;;  %s175_s7 = scalar_lea.vmem %s105_s6, 128  ;;  %p180_p3 = scmp.lt.s32.totalorder %s105_s6, %s105_s6 }
  0x29   :  { %p176_p2 = scmp.ne.s32.totalorder %s105_s6, %s175_s7  ;;  %p181_p4 = scmp.lt.s32.totalorder %s175_s7, %s175_s7 }
  0x2a   :  { %v71_v6 = vadd.f32 1e-12, %v69_v4  ;;  %v72_v7 = vadd.f32 1e-12, %v70_v5 }
  0x2b   :  { %p182_p5 = por %p181_p4, %p180_p3 }
  0x2c   :  { %v73_v8 = vand.u32 2147483647, %v71_v6  ;;  %v74_v9 = vand.u32 2147483647, %v72_v7 }
  0x2d   :  { %p183_p6 = pnand %p182_p5, %p176_p2 }
  0x2e   :  { %v75_v10 = vmul.f32 -2.0, %v73_v8  ;;  %v76_v11 = vmul.f32 -2.0, %v74_v9 }
  0x30   :  { %v77_v12 = vmul.f32 1.442695, %v75_v10  ;;  %v79_v13 = vmul.f32 1.442695, %v76_v11 }
  0x32   :  { %123 = vpow2.f32 %v77_v12 }
  0x33   :  { %125 = vpow2.f32 %v79_v13 }
  0x3c   :  { %v124_v14 = vpop.eup %123 }
  0x3d   :  { %v126_v15 = vpop.eup %125  ;;  %v81_v16 = vadd.f32 1.0, %v124_v14 }
  0x3e   :  { %v82_v17 = vadd.f32 1.0, %v126_v15 }
  0x3f   :  { %127 = vlog2.f32 %v81_v16 }
  0x40   :  { %129 = vlog2.f32 %v82_v17 }
  0x49   :  { %v128_v18 = vpop.eup %127 }
  0x4a   :  { %v130_v19 = vpop.eup %129  ;;  %v84_v20 = vmul.f32 0.6931472, %v128_v18 }
  0x4b   :  { %v86_v21 = vmul.f32 0.6931472, %v130_v19 }
  0x4c   :  { %v87_v22 = vadd.f32 %v84_v20, %v73_v8 }
  0x4d   :  { %v88_v23 = vadd.f32 %v86_v21, %v74_v9 }
  0x4f   :  { %v90_v24 = vadd.f32 %v88_v23, %v87_v22 }
  0x51   :  { %97 = vst [vmem:[#allocation8] sm:$0xff] %v90_v24 }
  0x52   :  { %186 = shalt.err (!%p183_p6)
}
  0x53   :  { %s187_s10 = scalar_lea.hbm %s261_s2, 128 }
  0x54   :  { %p188_p7 = scmp.ne.s32.totalorder %s261_s2, %s187_s10  ;;  %p191_p8 = scmp.lt.u32.totalorder %s187_s10, %s261_s2 }
  0x56   :  { %p193_p9 = pnand %p191_p8, %p188_p7 }
  0x58   :  { %196 = shalt.err (!%p193_p9)
}
  0x59   :  { %107 = dma.vmem_to_hbm [thread:$0]  %s105_s6, 128, %s261_s2, [#allocation5]  }
  0x5a   :  { %201 = dma.done.wait [#allocation5], 128  }
  0x5b   :  { %202 = vsyncadd [#allocation5], 4294967168 }
  0x5c   :  { %111 = vsyncpa [#allocation4], 1 }
  0x5d   :  { %112 = vsyncpa [#allocation7], 1 }
  0x5e   :  { %113 = vsyncpa [#allocation5], 1 }

</bundles_post_ra>
